<compile_context>
chip_gen: v5e
topology: v5e:2x2
jax: 0.10.0
libtpu: 0.0.40
codegen_flags: <defaults>
</compile_context>

<pallas_src>
import functools

import jax
import jax.numpy as jnp
from jax.experimental import pallas as pl
from jax.experimental.pallas import tpu as pltpu

HIDDEN = 32    # MLP hidden width per head (nn.Linear(in, 32))
LANES = 128    # TPU lane width; all packed blocks are zero-padded to this many columns


def _round8(v):
    return ((v + 7) // 8) * 8


def _fused_a2c_kernel(x_ref, ahat_ref, w_ref, b_ref, out_ref, *,
                      n_nodes, n_feat, rg, rows_pad, sp_cols, jitter):
    """Fused actor + taylor-actor + critic forward (single launch, no scratch).

    x:     (N, F)            node features
    ahat:  (N, N)            GCN-normalized dense adjacency
    w:     (2*rg+3*128, 128) packed weight slab (see pack_a2c_params)
    b:     (4, 128)          packed bias rows [bg; b1; b2; b3]
    out:   (rows_pad, 128)   rows 0..N-1: per-node actor/taylor, row N: critic
    """
    x = x_ref[...]                                    # (N, F)
    ahat = ahat_ref[...]                              # (N, N)

    # Static views into the packed weight slab (no extra DMA descriptors).
    wg = w_ref[pl.ds(0, n_feat), :]                   # (F, 128)  [Wg_a|Wg_t|Wg_c|0]
    proj = w_ref[pl.ds(rg, n_feat), :]                # (F, 128)  [I|I|I|0] residual
    w1 = w_ref[pl.ds(2 * rg, LANES), :]               # (128,128) blkdiag(W1_*) padded
    w2 = w_ref[pl.ds(2 * rg + LANES, LANES), :]       # (128,128) blkdiag(W2_*) padded
    w3 = w_ref[pl.ds(2 * rg + 2 * LANES, LANES), :]   # (128,128) blkdiag(W3_*) padded

    bg = b_ref[0:1, :]
    b1 = b_ref[1:2, :]
    b2 = b_ref[2:3, :]
    b3 = b_ref[3:4, :]

    # Shared GCN aggregation (weight independent), computed once for all heads.
    ax = jnp.dot(ahat, x, preferred_element_type=jnp.float32)              # (N, F)
    g = jnp.dot(ax, wg, preferred_element_type=jnp.float32) + bg           # (N, 128)
    # relu + residual skip ([x|x|x|0] via the identity projector; stays in vregs).
    h = jnp.maximum(g, 0.0) + jnp.dot(x, proj, preferred_element_type=jnp.float32)

    # Critic node-sum appended as extra rows; padding rows replicate the sum so the
    # activation stays sublane-aligned (only row n_nodes is read back by the wrapper).
    hsum = jnp.sum(h, axis=0, keepdims=True)                               # (1, 128)
    he = jnp.concatenate(
        [h, jnp.broadcast_to(hsum, (rows_pad - n_nodes, LANES))], axis=0)  # (rows_pad,128)

    # Fused 3-layer MLP over zero-padded block-diagonal weights.
    z = jnp.maximum(jnp.dot(he, w1, preferred_element_type=jnp.float32) + b1, 0.0)
    z = jnp.maximum(jnp.dot(z, w2, preferred_element_type=jnp.float32) + b2, 0.0)
    z = jnp.dot(z, w3, preferred_element_type=jnp.float32) + b3

    # Stable softplus + jitter on actor/taylor columns only; critic value stays raw.
    sp = jnp.maximum(z, 0.0) + jnp.log1p(jnp.exp(-jnp.abs(z))) + jitter
    col = jax.lax.broadcasted_iota(jnp.int32, z.shape, 1)
    out_ref[...] = jnp.where(col < sp_cols, sp, z)                         # dense store


def pack_a2c_params(actor_p, taylor_p, critic_p):
    """Pack all head parameters into one weight slab + one bias slab (done once).

    Weight slab rows (all LANES=128 columns, zero-padded):
      [0,       RG)        Wg = [Wg_a | Wg_t | Wg_c]          (F  valid rows)
      [RG,      2*RG)      residual projector [I_F|I_F|I_F]   (F  valid rows)
      [2*RG,    +128)      block_diag(W1_a, W1_t, W1_c)       (3F valid rows)
      [.. +128, +128)      block_diag(W2_a, W2_t, W2_c)       (3H valid rows)
      [.. +256, +128)      block_diag(W3_a, W3_t, W3_c)       (3H valid rows)
    Bias slab rows: bg, b1, b2, b3 (each zero-padded to 128 columns).
    """
    heads = (actor_p, taylor_p, critic_p)
    f = actor_p[0].shape[0]
    rg = _round8(f)

    def pad(a, rows):
        out = jnp.zeros((rows, LANES), jnp.float32)
        return out.at[: a.shape[0], : a.shape[1]].set(a.astype(jnp.float32))

    cat = lambda i: jnp.concatenate([p[i] for p in heads], axis=1)
    bd = lambda i: jax.scipy.linalg.block_diag(*[p[i] for p in heads])

    eye = jnp.eye(f, dtype=jnp.float32)
    proj = jnp.concatenate([eye, eye, eye], axis=1)               # (F, 3F)

    w_slab = jnp.concatenate([
        pad(cat(0), rg),       # Wg   (GCNConv weights, concatenated)
        pad(proj, rg),         # residual projector
        pad(bd(2), LANES),     # W1
        pad(bd(4), LANES),     # W2
        pad(bd(6), LANES),     # W3
    ], axis=0)
    b_slab = jnp.concatenate(
        [pad(cat(1), 1), pad(cat(3), 1), pad(cat(5), 1), pad(cat(7), 1)], axis=0)
    return w_slab, b_slab


def a2c_forward_fused(x, ahat, packed, *, d_dim=1, t_dim=3, jitter=1e-20):
    """Equivalent of A2C.forward: returns (concentration, taylor_params, value)."""
    w_slab, b_slab = packed
    n, f = x.shape
    rg = _round8(f)
    rows_pad = _round8(n + 1)
    sp_cols = d_dim + t_dim

    inputs = (x, ahat, w_slab, b_slab)
    flops = 2 * (n * n * f + 2 * n * f * LANES + 3 * rows_pad * LANES * LANES)
    bytes_accessed = sum(int(a.size) for a in inputs) * 4 + rows_pad * LANES * 4
    cost = pl.CostEstimate(flops=int(flops),
                           transcendentals=2 * rows_pad * LANES,
                           bytes_accessed=int(bytes_accessed))

    kernel = functools.partial(_fused_a2c_kernel, n_nodes=n, n_feat=f, rg=rg,
                               rows_pad=rows_pad, sp_cols=sp_cols, jitter=jitter)
    vmem = pl.BlockSpec(memory_space=pltpu.MemorySpace.VMEM)

    # Whole working set is a few hundred KB -> no grid, full-array VMEM blocks, one launch.
    out = pl.pallas_call(
        kernel,
        out_shape=jax.ShapeDtypeStruct((rows_pad, LANES), jnp.float32),
        in_specs=[vmem] * len(inputs),
        out_specs=vmem,
        cost_estimate=cost,
    )(*inputs)

    concentration = out[:n, 0]                                  # (N,)
    taylor_params = out[:n, d_dim:d_dim + t_dim]                # (N, T)
    value = out[n, d_dim + t_dim:d_dim + t_dim + 1]             # (1,)
    return concentration, taylor_params, value


def gcn_norm_adj(edge_index, n):
    """Dense normalized adjacency, matching PyG GCNConv defaults
    (add_self_loops=True, normalize=True): Ahat[dst, src] = d^-1/2[dst] d^-1/2[src].
    Cached per graph (hoisted out of the per-step forward)."""
    loop = jnp.arange(n, dtype=edge_index.dtype)
    src = jnp.concatenate([edge_index[0], loop])
    dst = jnp.concatenate([edge_index[1], loop])
    a = jnp.zeros((n, n), jnp.float32).at[dst, src].add(1.0)
    deg = jnp.sum(a, axis=1)
    dinv = jnp.where(deg > 0, 1.0 / jnp.sqrt(deg), 0.0)
    return dinv[:, None] * a * dinv[None, :]


def init_head_params(key, in_ch, out_dim, hidden=HIDDEN, scale=0.1):
    ks = jax.random.split(key, 8)
    f32 = jnp.float32
    return (
        jax.random.normal(ks[0], (in_ch, in_ch), f32) * scale,    # Wg (GCNConv)
        jax.random.normal(ks[1], (1, in_ch), f32) * scale,        # bg
        jax.random.normal(ks[2], (in_ch, hidden), f32) * scale,   # W1
        jax.random.normal(ks[3], (1, hidden), f32) * scale,       # b1
        jax.random.normal(ks[4], (hidden, hidden), f32) * scale,  # W2
        jax.random.normal(ks[5], (1, hidden), f32) * scale,       # b2
        jax.random.normal(ks[6], (hidden, out_dim), f32) * scale, # W3
        jax.random.normal(ks[7], (1, out_dim), f32) * scale,      # b3
    )


# ---------- plain-JAX unfused reference (for correctness check only) ----------
def _softplus_ref(v):
    return jnp.maximum(v, 0.0) + jnp.log1p(jnp.exp(-jnp.abs(v)))


def _head_ref(x, ahat, p, reduce_nodes=False):
    wg, bg, w1, b1, w2, b2, w3, b3 = p
    h = jnp.maximum(ahat @ (x @ wg) + bg, 0.0) + x
    if reduce_nodes:
        h = jnp.sum(h, axis=0, keepdims=True)
    h = jnp.maximum(h @ w1 + b1, 0.0)
    h = jnp.maximum(h @ w2 + b2, 0.0)
    return h @ w3 + b3


def a2c_forward_ref(x, ahat, actor_p, taylor_p, critic_p, jitter=1e-20):
    conc = (_softplus_ref(_head_ref(x, ahat, actor_p)) + jitter).reshape(-1)
    tay = _softplus_ref(_head_ref(x, ahat, taylor_p)) + jitter
    val = _head_ref(x, ahat, critic_p, reduce_nodes=True).reshape(-1)
    return conc, tay, val


if __name__ == "__main__":
    key = jax.random.PRNGKey(0)
    kx, ks, kd, ka, kt, kc = jax.random.split(key, 6)

    # GNNParser builds x of shape (nedges, 21) with T=10 -> 1 + 2*T = 21 features.
    N, F = 16, 21          # 16 graph nodes (env edges), 21 input features
    D, T = 1, 3            # Dirichlet dim, Taylor dim (estimate_bpr=True)

    x = jax.random.normal(kx, (N, F), jnp.float32)

    # random directed graph (edge_index, shape (2, E))
    E = 40
    src = jax.random.randint(ks, (E,), 0, N)
    dst = jax.random.randint(kd, (E,), 0, N)
    edge_index = jnp.stack([src, dst]).astype(jnp.int32)

    actor_p = init_head_params(ka, F, D)
    taylor_p = init_head_params(kt, F, T)
    critic_p = init_head_params(kc, F, 1)

    # Hoisted / cached per graph + per parameter set (not per forward step).
    ahat = gcn_norm_adj(edge_index, N)
    packed = pack_a2c_params(actor_p, taylor_p, critic_p)

    fwd = jax.jit(functools.partial(a2c_forward_fused, d_dim=D, t_dim=T))
    concentration, taylor_params, value = fwd(x, ahat, packed)
    jax.block_until_ready((concentration, taylor_params, value))

    assert concentration.shape == (N,)
    assert taylor_params.shape == (N, T)
    assert value.shape == (1,)

    # correctness vs. plain-JAX unfused reference
    c_ref, t_ref, v_ref = a2c_forward_ref(x, ahat, actor_p, taylor_p, critic_p)
    assert jnp.allclose(concentration, c_ref, rtol=1e-4, atol=1e-5)
    assert jnp.allclose(taylor_params, t_ref, rtol=1e-4, atol=1e-5)
    assert jnp.allclose(value, v_ref, rtol=1e-4, atol=1e-5)

    print("KERNEL_OK")
</pallas_src>

<mosaic_0001>
module attributes {stable_mosaic.version = 11 : i64} {
  func.func @_fused_a2c_kernel(%arg0: memref<16x21xf32, #tpu.memory_space<vmem>>, %arg1: memref<16x16xf32, #tpu.memory_space<vmem>>, %arg2: memref<432x128xf32, #tpu.memory_space<vmem>>, %arg3: memref<4x128xf32, #tpu.memory_space<vmem>>, %arg4: memref<24x128xf32, #tpu.memory_space<vmem>>) attributes {dimension_semantics = [], scalar_prefetch = 0 : i64, scratch_operands = 0 : i64, tpu.core_type = #tpu.core_type<tc>} {
    %c0 = arith.constant 0 : index
    %c0_0 = arith.constant 0 : index
    %0 = vector.load %arg0[%c0, %c0_0] : memref<16x21xf32, #tpu.memory_space<vmem>>, vector<16x21xf32>
    %c0_1 = arith.constant 0 : index
    %c0_2 = arith.constant 0 : index
    %1 = vector.load %arg1[%c0_1, %c0_2] : memref<16x16xf32, #tpu.memory_space<vmem>>, vector<16x16xf32>
    %c0_3 = arith.constant 0 : index
    %c0_4 = arith.constant 0 : index
    %2 = vector.load %arg2[%c0_3, %c0_4] : memref<432x128xf32, #tpu.memory_space<vmem>>, vector<21x128xf32>
    %c24 = arith.constant 24 : index
    %c0_5 = arith.constant 0 : index
    %3 = vector.load %arg2[%c24, %c0_5] : memref<432x128xf32, #tpu.memory_space<vmem>>, vector<21x128xf32>
    %c48 = arith.constant 48 : index
    %c0_6 = arith.constant 0 : index
    %4 = vector.load %arg2[%c48, %c0_6] : memref<432x128xf32, #tpu.memory_space<vmem>>, vector<128x128xf32>
    %c176 = arith.constant 176 : index
    %c0_7 = arith.constant 0 : index
    %5 = vector.load %arg2[%c176, %c0_7] : memref<432x128xf32, #tpu.memory_space<vmem>>, vector<128x128xf32>
    %c304 = arith.constant 304 : index
    %c0_8 = arith.constant 0 : index
    %6 = vector.load %arg2[%c304, %c0_8] : memref<432x128xf32, #tpu.memory_space<vmem>>, vector<128x128xf32>
    %c0_9 = arith.constant 0 : index
    %c0_10 = arith.constant 0 : index
    %7 = vector.load %arg3[%c0_9, %c0_10] : memref<4x128xf32, #tpu.memory_space<vmem>>, vector<1x128xf32>
    %c1 = arith.constant 1 : index
    %c0_11 = arith.constant 0 : index
    %8 = vector.load %arg3[%c1, %c0_11] : memref<4x128xf32, #tpu.memory_space<vmem>>, vector<1x128xf32>
    %c2 = arith.constant 2 : index
    %c0_12 = arith.constant 0 : index
    %9 = vector.load %arg3[%c2, %c0_12] : memref<4x128xf32, #tpu.memory_space<vmem>>, vector<1x128xf32>
    %c3 = arith.constant 3 : index
    %c0_13 = arith.constant 0 : index
    %10 = vector.load %arg3[%c3, %c0_13] : memref<4x128xf32, #tpu.memory_space<vmem>>, vector<1x128xf32>
    %cst = arith.constant dense<0.000000e+00> : vector<16x21xf32>
    %11 = tpu.matmul %1, %0, %cst {dimension_numbers = #tpu.dot_dimension_numbers<[1], [0], [0], [1], [0, 0, 1, 1], [], []>} : vector<16x16xf32>, vector<16x21xf32>, vector<16x21xf32> -> vector<16x21xf32>
    %cst_14 = arith.constant dense<0.000000e+00> : vector<16x128xf32>
    %12 = tpu.matmul %11, %2, %cst_14 {dimension_numbers = #tpu.dot_dimension_numbers<[1], [0], [0], [1], [0, 0, 1, 1], [], []>} : vector<16x21xf32>, vector<21x128xf32>, vector<16x128xf32> -> vector<16x128xf32>
    %13 = vector.broadcast %7 : vector<1x128xf32> to vector<16x128xf32>
    %14 = arith.addf %12, %13 : vector<16x128xf32>
    %cst_15 = arith.constant 0.000000e+00 : f32
    %15 = vector.broadcast %cst_15 : f32 to vector<16x128xf32>
    %16 = arith.maximumf %14, %15 : vector<16x128xf32>
    %cst_16 = arith.constant dense<0.000000e+00> : vector<16x128xf32>
    %17 = tpu.matmul %0, %3, %cst_16 {dimension_numbers = #tpu.dot_dimension_numbers<[1], [0], [0], [1], [0, 0, 1, 1], [], []>} : vector<16x21xf32>, vector<21x128xf32>, vector<16x128xf32> -> vector<16x128xf32>
    %18 = arith.addf %16, %17 : vector<16x128xf32>
    %cst_17 = arith.constant dense<0.000000e+00> : vector<128xf32>
    %19 = vector.multi_reduction <add>, %18, %cst_17 [0] : vector<16x128xf32> to vector<128xf32>
    %20 = vector.shape_cast %19 : vector<128xf32> to vector<1x128xf32>
    %21 = vector.shape_cast %20 : vector<1x128xf32> to vector<1x128xf32>
    %22 = vector.broadcast %21 : vector<1x128xf32> to vector<8x128xf32>
    %23 = tpu.concatenate %18, %22 in 0 : vector<16x128xf32>, vector<8x128xf32> -> vector<24x128xf32>
    %cst_18 = arith.constant dense<0.000000e+00> : vector<24x128xf32>
    %24 = tpu.matmul %23, %4, %cst_18 {dimension_numbers = #tpu.dot_dimension_numbers<[1], [0], [0], [1], [0, 0, 1, 1], [], []>} : vector<24x128xf32>, vector<128x128xf32>, vector<24x128xf32> -> vector<24x128xf32>
    %25 = vector.broadcast %8 : vector<1x128xf32> to vector<24x128xf32>
    %26 = arith.addf %24, %25 : vector<24x128xf32>
    %cst_19 = arith.constant 0.000000e+00 : f32
    %27 = vector.broadcast %cst_19 : f32 to vector<24x128xf32>
    %28 = arith.maximumf %26, %27 : vector<24x128xf32>
    %cst_20 = arith.constant dense<0.000000e+00> : vector<24x128xf32>
    %29 = tpu.matmul %28, %5, %cst_20 {dimension_numbers = #tpu.dot_dimension_numbers<[1], [0], [0], [1], [0, 0, 1, 1], [], []>} : vector<24x128xf32>, vector<128x128xf32>, vector<24x128xf32> -> vector<24x128xf32>
    %30 = vector.broadcast %9 : vector<1x128xf32> to vector<24x128xf32>
    %31 = arith.addf %29, %30 : vector<24x128xf32>
    %cst_21 = arith.constant 0.000000e+00 : f32
    %32 = vector.broadcast %cst_21 : f32 to vector<24x128xf32>
    %33 = arith.maximumf %31, %32 : vector<24x128xf32>
    %cst_22 = arith.constant dense<0.000000e+00> : vector<24x128xf32>
    %34 = tpu.matmul %33, %6, %cst_22 {dimension_numbers = #tpu.dot_dimension_numbers<[1], [0], [0], [1], [0, 0, 1, 1], [], []>} : vector<24x128xf32>, vector<128x128xf32>, vector<24x128xf32> -> vector<24x128xf32>
    %35 = vector.broadcast %10 : vector<1x128xf32> to vector<24x128xf32>
    %36 = arith.addf %34, %35 : vector<24x128xf32>
    %cst_23 = arith.constant 0.000000e+00 : f32
    %37 = vector.broadcast %cst_23 : f32 to vector<24x128xf32>
    %38 = arith.maximumf %36, %37 : vector<24x128xf32>
    %39 = math.absf %36 : vector<24x128xf32>
    %cst_24 = arith.constant 0.000000e+00 : f32
    %40 = vector.broadcast %cst_24 : f32 to vector<24x128xf32>
    %41 = arith.subf %40, %39 : vector<24x128xf32>
    %42 = math.exp %41 : vector<24x128xf32>
    %43 = math.log1p %42 : vector<24x128xf32>
    %44 = arith.addf %38, %43 : vector<24x128xf32>
    %cst_25 = arith.constant 9.99999968E-21 : f32
    %45 = vector.broadcast %cst_25 : f32 to vector<24x128xf32>
    %46 = arith.addf %44, %45 : vector<24x128xf32>
    %47 = tpu.iota {dimensions = array<i32: 1>} : vector<24x128xi32>
    %c4_i32 = arith.constant 4 : i32
    %48 = vector.broadcast %c4_i32 : i32 to vector<24x128xi32>
    %49 = arith.cmpi slt, %47, %48 : vector<24x128xi32>
    %50 = arith.select %49, %46, %36 : vector<24x128xi1>, vector<24x128xf32>
    %c0_26 = arith.constant 0 : index
    %c0_27 = arith.constant 0 : index
    %51 = vector.load %arg4[%c0_26, %c0_27] : memref<24x128xf32, #tpu.memory_space<vmem>>, vector<24x128xf32>
    tpu.vector_store %arg4[%c0_26, %c0_27], %50 {strides = array<i32>} : memref<24x128xf32, #tpu.memory_space<vmem>>, vector<24x128xf32>,
    return
  }
}

</mosaic_0001>

<bundles_post_ra>
// kernel: a2c_forward_fused.1
= control target key start
LH: loop header
LB: loop body
LE: loop exit
PB: predicated region body
PF: predicated region fallthrough
CT: control target
= control target key end

     0   :  { %9 = vsyncpa [#allocation3], 0  ;;  %s608_s0 = inlined_call_operand.hbm [shape: f32[16,21], index: 0, kind: input, shape index: {}]   ;;  %s609_s1 = inlined_call_operand.hbm [shape: f32[16,16], index: 1, kind: input, shape index: {}]   ;;  %s610_s2 = inlined_call_operand.hbm [shape: f32[432,128], index: 2, kind: input, shape index: {}]   ;;  %s611_s3 = inlined_call_operand.hbm [shape: f32[4,128], index: 3, kind: input, shape index: {}]   ;;  %s612_s4 = inlined_call_operand.vmem [shape: f32[24,128], index: 4, kind: output, shape index: {}]  }
   0x1   :  { %10 = vsyncpa [#allocation5], 0 }
   0x2   :  { %11 = vsyncpa [#allocation8], 0  ;;  %s29_s17 = sshll.u32 %s609_s1, 4  ;;  %s547_s18 = smov [#allocation4]   ;;  %s30_s17 = int_to_ptr.hbm [resolvable:$true] %s29_s17 }
   0x3   :  { %s31_s19 = sshll.u32 %s547_s18, 4  ;;  %s16_s22 = sshll.u32 %s608_s0, 4  ;;  %s32_s19 = int_to_ptr.vmem [resolvable:$true] %s31_s19  ;;  %s17_s22 = int_to_ptr.hbm [resolvable:$true] %s16_s22 }
   0x4   :  { %s548_s23 = smov 128   ;;  %s549_s24 = smov 8  }
   0x5   :  { %37 = dma.hbm_to_vmem [thread:$0]  %s30_s17, 256, %s32_s19, [#allocation5], %s548_s23, %s548_s23, %s549_s24  }
   0x6   :  { %s550_s25 = smov [#allocation2]   ;;  %s42_s29 = sshll.u32 %s610_s2, 4  ;;  %s43_s29 = int_to_ptr.hbm [resolvable:$true] %s42_s29 }
   0x7   :  { %s18_s26 = sshll.u32 %s550_s25, 4  ;;  %s56_s5 = sshll.u32 %s611_s3, 4  ;;  %s19_s26 = int_to_ptr.vmem [resolvable:$true] %s18_s26  ;;  %s57_s5 = int_to_ptr.hbm [resolvable:$true] %s56_s5 }
   0x8   :  { %24 = dma.hbm_to_vmem [thread:$0]  %s17_s22, 256, %s19_s26, [#allocation3], %s548_s23, %s548_s23, %s549_s24  }
   0x9   :  { %s551_s6 = smov [#allocation6]   ;;  %s552_s0 = smov [#allocation7]  }
   0xa   :  { %s44_s7 = sshll.u32 %s551_s6, 4  ;;  %s58_s8 = sshll.u32 %s552_s0, 4  ;;  %s45_s7 = int_to_ptr.vmem [resolvable:$true] %s44_s7  ;;  %s59_s8 = int_to_ptr.vmem [resolvable:$true] %s58_s8 }
   0xb   :  { %50 = dma.hbm_to_vmem [thread:$0]  %s43_s29, 6912, %s45_s7, [#allocation5], %s548_s23, %s548_s23, %s549_s24  }
   0xc   :  { %61 = dma.hbm_to_vmem [thread:$0]  %s57_s5, 64, %s59_s8, [#allocation8]  }
   0xd   :  { %541 = dma.done.wait [#allocation3], 256  }
   0xe   :  { %542 = vsyncadd [#allocation3], 4294967040 }
   0xf   :  { %543 = dma.done.wait [#allocation5], 7168  }
  0x10   :  { %544 = vsyncadd [#allocation5], 4294960128 }
  0x11   :  { %545 = dma.done.wait [#allocation8], 64  }
  0x12   :  { %546 = vsyncadd [#allocation8], 4294967232  ;;  %vm178_vm0 = vcmask 1044480   ;;  %v79_v0 = vld [vmem:[#allocation2 + $0x8] sm:$0xff]  ;;  %v78_v1 = vld [vmem:[#allocation2] sm:$0xff]  ;;  %vm140_vm1 = vcmask 130048  }
  0x13   :  { %161 = vmatpush.msra.mxu0 %v79_v0  ;;  %v80_v2 = vld [vmem:[#allocation4] sm:$0xff]  ;;  %v87_v3 = vld [vmem:[#allocation6 + $0x28] sm:$0x1f]  ;;  %v86_v5 = vld [vmem:[#allocation6 + $0x20] sm:$0xff]  ;;  %vm171_vm2 = vcmask 171008  }
  0x14   :  { %v84_v4 = vld [vmem:[#allocation6 + $0x10] sm:$0x1f]  ;;  %404 = vmatpush.msk.msra.mxu2 %vm178_vm0, %v87_v3  ;;  %v83_v6 = vld [vmem:[#allocation6 + $0x8] sm:$0xff]  ;;  %v85_v7 = vld [vmem:[#allocation6 + $0x18] sm:$0xff] }
  0x15   :  { %401 = vmatpush.msk.msra.mxu1 %vm178_vm0, %v84_v4  ;;  %162 = vmatpush.msra.mxu0 %v78_v1  ;;  %v81_v8 = vld [vmem:[#allocation4 + $0x8] sm:$0xff]  ;;  %v82_v9 = vld [vmem:[#allocation6] sm:$0xff]  ;;  %v103_v10 = vld [vmem:[#allocation6 + $0xa8] sm:$0xff] }
  0x16   :  { %399 = vmatmul.msk.f32.vlgmr.msra.gmra.mxu0 %vm140_vm1, %v80_v2  ;;  %230 = vmatpush.msra.mxu2 %v86_v5  ;;  %v102_v11 = vld [vmem:[#allocation6 + $0xa0] sm:$0xff]  ;;  %v101_v12 = vld [vmem:[#allocation6 + $0x98] sm:$0xff]  ;;  %v100_v13 = vld [vmem:[#allocation6 + $0x90] sm:$0xff] }
  0x17   :  { %196 = vmatpush.msra.mxu1 %v83_v6  ;;  %249 = vmatpush.msra.mxu3 %v103_v10  ;;  %v99_v14 = vld [vmem:[#allocation6 + $0x88] sm:$0xff]  ;;  %v98_v15 = vld [vmem:[#allocation6 + $0x80] sm:$0xff]  ;;  %v97_v16 = vld [vmem:[#allocation6 + $0x78] sm:$0xff] }
  0x18   :  { %231 = vmatpush.msra.mxu2 %v85_v7  ;;  %v96_v17 = vld [vmem:[#allocation6 + $0x70] sm:$0xff]  ;;  %v95_v18 = vld [vmem:[#allocation6 + $0x68] sm:$0xff]  ;;  %v94_v19 = vld [vmem:[#allocation6 + $0x60] sm:$0xff] }
  0x19   :  { %405 = vmatmul.msk.f32.vlgmr.msra.gmra.mxu2 %vm171_vm2, %v78_v1  ;;  %197 = vmatpush.msra.mxu1 %v82_v9  ;;  %v93_v20 = vld [vmem:[#allocation6 + $0x58] sm:$0xff]  ;;  %v92_v21 = vld [vmem:[#allocation6 + $0x50] sm:$0xff]  ;;  %v91_v24 = vld [vmem:[#allocation6 + $0x48] sm:$0xff] }
  0x1a   :  { %250 = vmatpush.msra.mxu3 %v102_v11  ;;  %v90_v25 = vld [vmem:[#allocation6 + $0x40] sm:$0xff]  ;;  %v89_v26 = vld [vmem:[#allocation6 + $0x38] sm:$0xff]  ;;  %v88_v27 = vld [vmem:[#allocation6 + $0x30] sm:$0xff] }
  0x1b   :  { %v429_v28 = vld [vmem:[#allocation7] ss:$0 sm:$0xff]  ;;  %v119_v29 = vld [vmem:[#allocation6 + $0x128] sm:$0xff]  ;;  %v118_v30 = vld [vmem:[#allocation6 + $0x120] sm:$0xff] }
  0x1c   :  { %251 = vmatpush.msra.mxu3 %v101_v12  ;;  %279 = vmatpush.msrb.mxu0 %v119_v29  ;;  %v117_v31 = vld [vmem:[#allocation6 + $0x118] sm:$0xff]  ;;  %v116_v35 = vld [vmem:[#allocation6 + $0x110] sm:$0xff]  ;;  %v115_v37 = vld [vmem:[#allocation6 + $0x108] sm:$0xff] }
  0x1d   :  { %v114_v39 = vld [vmem:[#allocation6 + $0x100] sm:$0xff]  ;;  %v113_v40 = vld [vmem:[#allocation6 + $0xf8] sm:$0xff]  ;;  %v112_v43 = vld [vmem:[#allocation6 + $0xf0] sm:$0xff] }
  0x1e   :  { %400 = vmatmul.msk.f32.gmra.mxu0 %vm140_vm1, %v81_v8  ;;  %252 = vmatpush.msra.mxu3 %v100_v13  ;;  %v111_v46 = vld [vmem:[#allocation6 + $0xe8] sm:$0xff]  ;;  %v110_v48 = vld [vmem:[#allocation6 + $0xe0] sm:$0xff]  ;;  %v109_v50 = vld [vmem:[#allocation6 + $0xd8] sm:$0xff] }
  0x1f   :  { %280 = vmatpush.msrb.mxu0 %v118_v30  ;;  %v108_v52 = vld [vmem:[#allocation6 + $0xd0] sm:$0xff]  ;;  %v107_v54 = vld [vmem:[#allocation6 + $0xc8] sm:$0xff]  ;;  %v106_v59 = vld [vmem:[#allocation6 + $0xc0] sm:$0xff] }
  0x20   :  { %253 = vmatpush.msra.mxu3 %v99_v14  ;;  %v105_v60 = vld [vmem:[#allocation6 + $0xb8] sm:$0xff]  ;;  %v104_v61 = vld [vmem:[#allocation6 + $0xb0] sm:$0xff]  ;;  %v135_v62 = vld [vmem:[#allocation6 + $0x1a8] sm:$0xff] }
  0x21   :  { %406 = vmatmul.msk.f32.gmra.mxu2 %vm171_vm2, %v79_v0  ;;  %281 = vmatpush.msrb.mxu0 %v117_v31  ;;  %v134_v63 = vld [vmem:[#allocation6 + $0x1a0] sm:$0xff]  ;;  %v430_v0 = vld [vmem:[#allocation7 + $0x1] ss:$0 sm:$0xff]  ;;  %v133_v1 = vld [vmem:[#allocation6 + $0x198] sm:$0xff] }
  0x22   :  { %254 = vmatpush.msra.mxu3 %v98_v15  ;;  %309 = vmatpush.msrb.mxu1 %v135_v62  ;;  %v132_v2 = vld [vmem:[#allocation6 + $0x190] sm:$0xff]  ;;  %v131_v5 = vld [vmem:[#allocation6 + $0x188] sm:$0xff]  ;;  %v130_v7 = vld [vmem:[#allocation6 + $0x180] sm:$0xff] }
  0x23   :  { %282 = vmatpush.msrb.mxu0 %v116_v35  ;;  %407 = vmatpush.msrb.mxu2 %v135_v62  ;;  %v129_v8 = vld [vmem:[#allocation6 + $0x178] sm:$0xff]  ;;  %v128_v9 = vld [vmem:[#allocation6 + $0x170] sm:$0xff]  ;;  %v127_v12 = vld [vmem:[#allocation6 + $0x168] sm:$0xff] }
  0x24   :  { %255 = vmatpush.msra.mxu3 %v97_v16  ;;  %310 = vmatpush.msrb.mxu1 %v134_v63  ;;  %v126_v14 = vld [vmem:[#allocation6 + $0x160] sm:$0xff]  ;;  %v125_v15 = vld [vmem:[#allocation6 + $0x158] sm:$0xff]  ;;  %v124_v16 = vld [vmem:[#allocation6 + $0x150] sm:$0xff] }
  0x25   :  { %283 = vmatpush.msrb.mxu0 %v115_v37  ;;  %408 = vmatpush.msrb.mxu2 %v134_v63 }
  0x26   :  { %256 = vmatpush.msra.mxu3 %v96_v17  ;;  %311 = vmatpush.msrb.mxu1 %v133_v1  ;;  %v123_v17 = vld [vmem:[#allocation6 + $0x148] sm:$0xff] }
  0x27   :  { %284 = vmatpush.msrb.mxu0 %v114_v39  ;;  %409 = vmatpush.msrb.mxu2 %v133_v1 }
  0x28   :  { %257 = vmatpush.msra.mxu3 %v95_v18  ;;  %312 = vmatpush.msrb.mxu1 %v132_v2 }
  0x29   :  { %285 = vmatpush.msrb.mxu0 %v113_v40  ;;  %410 = vmatpush.msrb.mxu2 %v132_v2 }
  0x2a   :  { %258 = vmatpush.msra.mxu3 %v94_v19  ;;  %313 = vmatpush.msrb.mxu1 %v131_v5 }
  0x2b   :  { %286 = vmatpush.msrb.mxu0 %v112_v43  ;;  %411 = vmatpush.msrb.mxu2 %v131_v5 }
  0x2c   :  { %259 = vmatpush.msra.mxu3 %v93_v20  ;;  %314 = vmatpush.msrb.mxu1 %v130_v7 }
  0x2d   :  { %287 = vmatpush.msrb.mxu0 %v111_v46  ;;  %412 = vmatpush.msrb.mxu2 %v130_v7 }
  0x2e   :  { %260 = vmatpush.msra.mxu3 %v92_v21  ;;  %315 = vmatpush.msrb.mxu1 %v129_v8  ;;  %v122_v21 = vld [vmem:[#allocation6 + $0x140] sm:$0xff] }
  0x2f   :  { %288 = vmatpush.msrb.mxu0 %v110_v48  ;;  %413 = vmatpush.msrb.mxu2 %v129_v8  ;;  %v383_v48 = vlaneseq }
  0x30   :  { %261 = vmatpush.msra.mxu3 %v91_v24  ;;  %316 = vmatpush.msrb.mxu1 %v128_v9  ;;  %v431_v24 = vld [vmem:[#allocation7 + $0x2] ss:$0 sm:$0xff] }
  0x31   :  { %289 = vmatpush.msrb.mxu0 %v109_v50  ;;  %414 = vmatpush.msrb.mxu2 %v128_v9 }
  0x32   :  { %262 = vmatpush.msra.mxu3 %v90_v25  ;;  %317 = vmatpush.msrb.mxu1 %v127_v12 }
  0x33   :  { %290 = vmatpush.msrb.mxu0 %v108_v52  ;;  %415 = vmatpush.msrb.mxu2 %v127_v12 }
  0x34   :  { %263 = vmatpush.msra.mxu3 %v89_v26  ;;  %318 = vmatpush.msrb.mxu1 %v126_v14 }
  0x35   :  { %291 = vmatpush.msrb.mxu0 %v107_v54  ;;  %416 = vmatpush.msrb.mxu2 %v126_v14  ;;  %v384_v54 = vand.u32 127, %v383_v48 }
  0x36   :  { %264 = vmatpush.msra.mxu3 %v88_v27  ;;  %319 = vmatpush.msrb.mxu1 %v125_v15 }
  0x37   :  { %292 = vmatpush.msrb.mxu0 %v106_v59  ;;  %417 = vmatpush.msrb.mxu2 %v125_v15  ;;  %vm385_vm4 = vcmp.lt.s32.totalorder %v384_v54, 4 }
  0x38   :  { %320 = vmatpush.msrb.mxu1 %v124_v16 }
  0x39   :  { %293 = vmatpush.msrb.mxu0 %v105_v60  ;;  %418 = vmatpush.msrb.mxu2 %v124_v16 }
  0x3a   :  { %321 = vmatpush.msrb.mxu1 %v123_v17 }
  0x3b   :  { %294 = vmatpush.msrb.mxu0 %v104_v61  ;;  %419 = vmatpush.msrb.mxu2 %v123_v17 }
  0x3c   :  { %322 = vmatpush.msrb.mxu1 %v122_v21 }
  0x3d   :  { %420 = vmatpush.msrb.mxu2 %v122_v21 }
  0x93   :  { %v164_v22 = vpop.f32.mrf.mxu0 }
  0x94   :  { %402 = vmatmul.msk.f32.vlgmr.msra.gmra.mxu1 %vm171_vm2, %v164_v22  ;;  %v121_v22 = vld [vmem:[#allocation6 + $0x138] sm:$0xff] }
  0x95   :  { %323 = vmatpush.msrb.mxu1 %v121_v22  ;;  %421 = vmatpush.msrb.mxu2 %v121_v22 }
  0x9b   :  { %v167_v23 = vpop.f32.mrf.mxu0 }
  0x9c   :  { %403 = vmatmul.msk.f32.gmra.mxu1 %vm171_vm2, %v167_v23  ;;  %v233_v33 = vpop.f32.mrf.mxu2  ;;  %v120_v23 = vld [vmem:[#allocation6 + $0x130] sm:$0xff] }
  0x9d   :  { %324 = vmatpush.msrb.mxu1 %v120_v23  ;;  %422 = vmatpush.msrb.mxu2 %v120_v23 }
  0xa4   :  { %v236_v44 = vpop.f32.mrf.mxu2 }
 0x111   :  { %v199_v32 = vpop.f32.mrf.mxu1 }
 0x112   :  { %v200_v34 = vadd.f32 %v429_v28, %v199_v32 }
 0x114   :  { %v205_v36 = vmax.f32 %v200_v34, 0.0  ;;  %v432_v34 = vld [vmem:[#allocation7 + $0x3] ss:$0 sm:$0xff] }
 0x116   :  { %v239_v38 = vadd.f32 %v233_v33, %v205_v36 }
 0x118   :  { %265 = vmatmul.f32.vlgmr.msra.gmra.mxu3 %v239_v38 }
 0x119   :  { %v202_v41 = vpop.f32.mrf.mxu1 }
 0x11a   :  { %v203_v42 = vadd.f32 %v429_v28, %v202_v41 }
 0x11c   :  { %v206_v45 = vmax.f32 %v203_v42, 0.0 }
 0x11e   :  { %v240_v47 = vadd.f32 %v236_v44, %v206_v45 }
 0x120   :  { %v241_v49 = vadd.f32 %v240_v47, %v239_v38  ;;  %268 = vmatmul.f32.gmra.mxu3 %v240_v47 }
 0x122   :  { %v242_v51 = vrot.slane %v241_v49, 4 }
 0x124   :  { %v243_v53 = vadd.f32 %v242_v51, %v241_v49 }
 0x126   :  { %v244_v55 = vrot.slane %v243_v53, 2 }
 0x128   :  { %v245_v56 = vadd.f32 %v244_v55, %v243_v53 }
 0x12a   :  { %v246_v57 = vrot.slane %v245_v56, 1 }
 0x12c   :  { %v247_v58 = vadd.f32 %v246_v57, %v245_v56 }
 0x12e   :  { %271 = vmatmul.f32.gmra.mxu3 %v247_v58 }
 0x19b   :  { %v266_v3 = vpop.f32.mrf.mxu3 }
 0x19c   :  { %v267_v4 = vadd.f32 %v430_v0, %v266_v3 }
 0x19e   :  { %v275_v6 = vmax.f32 %v267_v4, 0.0 }
 0x1a0   :  { %295 = vmatmul.f32.vlgmr.msrb.gmra.mxu0 %v275_v6 }
 0x1a3   :  { %v269_v10 = vpop.f32.mrf.mxu3 }
 0x1a4   :  { %v270_v11 = vadd.f32 %v430_v0, %v269_v10 }
 0x1a6   :  { %v276_v13 = vmax.f32 %v270_v11, 0.0 }
 0x1a8   :  { %298 = vmatmul.f32.gmra.mxu0 %v276_v13 }
 0x1b1   :  { %v272_v18 = vpop.f32.mrf.mxu3 }
 0x1b2   :  { %v273_v19 = vadd.f32 %v430_v0, %v272_v18 }
 0x1b4   :  { %v277_v20 = vmax.f32 %v273_v19, 0.0 }
 0x1b6   :  { %301 = vmatmul.f32.gmra.mxu0 %v277_v20 }
 0x21d   :  { %v296_v25 = vpop.f32.mrf.mxu0 }
 0x21e   :  { %v297_v26 = vadd.f32 %v431_v24, %v296_v25 }
 0x220   :  { %v305_v27 = vmax.f32 %v297_v26, 0.0 }
 0x222   :  { %325 = vmatmul.f32.vlgmr.msrb.gmra.mxu1 %v305_v27 }
 0x225   :  { %v299_v28 = vpop.f32.mrf.mxu0 }
 0x226   :  { %v300_v29 = vadd.f32 %v431_v24, %v299_v28 }
 0x228   :  { %v306_v30 = vmax.f32 %v300_v29, 0.0 }
 0x22a   :  { %328 = vmatmul.f32.vlgmr.msrb.gmra.mxu2 %v306_v30 }
 0x233   :  { %v302_v31 = vpop.f32.mrf.mxu0 }
 0x234   :  { %v303_v32 = vadd.f32 %v431_v24, %v302_v31 }
 0x236   :  { %v307_v33 = vmax.f32 %v303_v32, 0.0 }
 0x238   :  { %331 = vmatmul.f32.gmra.mxu2 %v307_v33 }
 0x29f   :  { %v326_v35 = vpop.f32.mrf.mxu1 }
 0x2a0   :  { %v327_v36 = vadd.f32 %v432_v34, %v326_v35 }
 0x2a2   :  { %v338_v37 = vand.u32 2147483647, %v327_v36  ;;  %v335_v55 = vmax.f32 %v327_v36, 0.0 }
 0x2a4   :  { %v341_v38 = vsub.f32 0.0, %v338_v37 }
 0x2a6   :  { %v344_v39 = vmul.f32 1.442695, %v341_v38 }
 0x2a8   :  { %433 = vpow2.f32 %v344_v39 }
 0x2ad   :  { %v329_v40 = vpop.f32.mrf.mxu2 }
 0x2ae   :  { %v434_v41 = vpop.eup %433  ;;  %v330_v42 = vadd.f32 %v432_v34, %v329_v40 }
 0x2af   :  { %v350_v43 = vadd.f32 1.0, %v434_v41  ;;  %v353_v44 = vmul.f32 -0.5, %v434_v41  ;;  %v356_v50 = vand.u32 2147483647, %v434_v41 }
 0x2b0   :  { %v339_v45 = vand.u32 2147483647, %v330_v42  ;;  %v336_v9 = vmax.f32 %v330_v42, 0.0 }
 0x2b1   :  { %435 = vlog2.f32 %v350_v43  ;;  %v354_v47 = vadd.f32 1.0, %v353_v44  ;;  %vm357_vm3 = vcmp.lt.f32.partialorder %v356_v50, 0.0004427343 }
 0x2b2   :  { %v342_v46 = vsub.f32 0.0, %v339_v45 }
 0x2b3   :  { %v355_v53 = vmul.f32 %v434_v41, %v354_v47 }
 0x2b4   :  { %v346_v49 = vmul.f32 1.442695, %v342_v46 }
 0x2b6   :  { %437 = vpow2.f32 %v346_v49 }
 0x2b7   :  { %v436_v51 = vpop.eup %435 }
 0x2b8   :  { %v352_v52 = vmul.f32 0.6931472, %v436_v51 }
 0x2ba   :  { %v358_v56 = vsel %vm357_vm3, %v355_v53, %v352_v52 }
 0x2bb   :  { %v377_v57 = vadd.f32 %v358_v56, %v335_v55  ;;  %v332_v58 = vpop.f32.mrf.mxu2 }
 0x2bc   :  { %v438_v59 = vpop.eup %437  ;;  %v333_v60 = vadd.f32 %v432_v34, %v332_v58 }
 0x2bd   :  { %v380_v61 = vadd.f32 1e-20, %v377_v57  ;;  %v359_v62 = vadd.f32 1.0, %v438_v59  ;;  %v362_v63 = vmul.f32 -0.5, %v438_v59  ;;  %v365_v5 = vand.u32 2147483647, %v438_v59 }
 0x2be   :  { %v340_v0 = vand.u32 2147483647, %v333_v60  ;;  %v337_v22 = vmax.f32 %v333_v60, 0.0 }
 0x2bf   :  { %v386_v1 = vsel %vm385_vm4, %v380_v61, %v327_v36  ;;  %439 = vlog2.f32 %v359_v62  ;;  %v363_v3 = vadd.f32 1.0, %v362_v63  ;;  %vm366_vm5 = vcmp.lt.f32.partialorder %v365_v5, 0.0004427343 }
 0x2c0   :  { %389 = vst [vmem:[%s612_s4] sm:$0xff] %v386_v1  ;;  %v343_v2 = vsub.f32 0.0, %v340_v0 }
 0x2c1   :  { %v364_v8 = vmul.f32 %v438_v59, %v363_v3 }
 0x2c2   :  { %v348_v4 = vmul.f32 1.442695, %v343_v2 }
 0x2c4   :  { %441 = vpow2.f32 %v348_v4 }
 0x2c5   :  { %v440_v6 = vpop.eup %439 }
 0x2c6   :  { %v361_v7 = vmul.f32 0.6931472, %v440_v6 }
 0x2c8   :  { %v367_v10 = vsel %vm366_vm5, %v364_v8, %v361_v7 }
 0x2c9   :  { %v378_v11 = vadd.f32 %v367_v10, %v336_v9 }
 0x2ca   :  { %v442_v12 = vpop.eup %441 }
 0x2cb   :  { %v381_v13 = vadd.f32 1e-20, %v378_v11  ;;  %v368_v14 = vadd.f32 1.0, %v442_v12  ;;  %v371_v15 = vmul.f32 -0.5, %v442_v12  ;;  %v374_v18 = vand.u32 2147483647, %v442_v12 }
 0x2cd   :  { %v387_v16 = vsel %vm385_vm4, %v381_v13, %v330_v42  ;;  %443 = vlog2.f32 %v368_v14  ;;  %v372_v17 = vadd.f32 1.0, %v371_v15  ;;  %vm375_vm6 = vcmp.lt.f32.partialorder %v374_v18, 0.0004427343 }
 0x2ce   :  { %390 = vst [vmem:[%s612_s4 + $0x8] sm:$0xff] %v387_v16 }
 0x2cf   :  { %v373_v21 = vmul.f32 %v442_v12, %v372_v17 }
 0x2d3   :  { %v444_v19 = vpop.eup %443 }
 0x2d4   :  { %v370_v20 = vmul.f32 0.6931472, %v444_v19 }
 0x2d6   :  { %v376_v23 = vsel %vm375_vm6, %v373_v21, %v370_v20 }
 0x2d7   :  { %v379_v24 = vadd.f32 %v376_v23, %v337_v22 }
 0x2d9   :  { %v382_v25 = vadd.f32 1e-20, %v379_v24 }
 0x2db   :  { %v388_v26 = vsel %vm385_vm4, %v382_v25, %v333_v60 }
 0x2dc   :  { %391 = vst [vmem:[%s612_s4 + $0x10] sm:$0xff] %v388_v26 }
 0x2dd   :  { %396 = vsyncpa [#allocation3], 1 }
 0x2de   :  { %397 = vsyncpa [#allocation5], 1 }
 0x2df   :  { %398 = vsyncpa [#allocation8], 1 }

</bundles_post_ra>
